<compile_context>
chip_gen: v7x
topology: tpu7x:2x2x1
jax: 0.10.0
libtpu: 0.0.40
codegen_flags: <defaults>
</compile_context>

<pallas_src>
import functools

import jax
import jax.numpy as jnp
from jax import lax
from jax.experimental import pallas as pl
from jax.experimental.pallas import tpu as pltpu

_MASK_VALUE = -1e30  # large finite negative instead of -inf (avoids NaN rows)


def _sdpa_kernel(q_ref, k_ref, v_ref, bias_ref, out_ref, attn_ref,
                 *, temperature):
    # q_ref: (tq, Dk), k_ref: (Lk, Dk), v_ref: (Lk, Dv), bias_ref: (tq, Lk) f32
    q = q_ref[...]
    k = k_ref[...]
    v = v_ref[...]

    # scores = (q @ k^T) / temperature + bias   (f32 accumulation on the MXU,
    # contraction on the last dims so no explicit transpose of k is formed)
    scores = lax.dot_general(
        q, k, (((1,), (1,)), ((), ())),
        preferred_element_type=jnp.float32)
    scores = scores * (1.0 / temperature) + bias_ref[...]

    # numerically-stable softmax over the key dimension
    m = jnp.max(scores, axis=-1, keepdims=True)
    e = jnp.exp(scores - m)
    s = jnp.sum(e, axis=-1, keepdims=True)
    p = e * pl.reciprocal(s, approx=True)

    # output = attn @ v  (probabilities in v's dtype, f32 accumulation)
    out = lax.dot_general(
        p.astype(v.dtype), v, (((1,), (0,)), ((), ())),
        preferred_element_type=jnp.float32)

    out_ref[...] = out.astype(out_ref.dtype)
    attn_ref[...] = p.astype(attn_ref.dtype)


def _pick_tq(Lq, Lk, Dk, Dv, itemsize, budget_bytes=20 * 1024 * 1024):
    """Largest q-tile (multiple of 8, divisor of Lq) whose per-step VMEM fits."""
    smallest_divisor = None
    for tq in (512, 256, 128, 64, 32, 16, 8):
        if Lq % tq:
            continue
        smallest_divisor = tq
        # double-buffered input/output tiles + in-kernel f32 temporaries
        io_bytes = 2 * (itemsize * (tq * Dk + Lk * Dk + Lk * Dv
                                    + tq * Dv + tq * Lk)   # q, k, v, out, attn
                        + 4 * tq * Lk)                     # f32 bias tile
        tmp_bytes = 3 * 4 * tq * Lk                        # scores / exp / probs
        if io_bytes + tmp_bytes <= budget_bytes:
            return tq
    return smallest_divisor if smallest_divisor is not None else Lq


def scaled_dot_product_attention(q, k, v, temperature, mask=None,
                                 attn_bias=None):
    """q: [B,H,Lq,Dk], k: [B,H,Lk,Dk], v: [B,H,Lk,Dv] -> (output, attn)."""
    B, H, Lq, Dk = q.shape
    Lk = k.shape[2]
    Dv = v.shape[3]

    # Fold attn_bias and mask into one additive f32 [Lq, Lk] tensor.
    if attn_bias is None:
        bias = jnp.zeros((Lq, Lk), dtype=jnp.float32)
    else:
        bias = jnp.asarray(attn_bias).reshape(Lq, Lk).astype(jnp.float32)
    if mask is not None:
        # TODO(synk): masks that genuinely vary per (batch, head); the common
        # causal / padding mask broadcasts over batch and head and folds here.
        mask2d = jnp.asarray(mask).reshape(Lq, Lk)
        bias = jnp.where(mask2d == 0, _MASK_VALUE, bias)

    tq = _pick_tq(Lq, Lk, Dk, Dv, jnp.dtype(q.dtype).itemsize)
    grid = (B, H, Lq // tq)

    kernel = functools.partial(_sdpa_kernel, temperature=float(temperature))

    out, attn = pl.pallas_call(
        kernel,
        out_shape=(
            jax.ShapeDtypeStruct((B, H, Lq, Dv), q.dtype),
            jax.ShapeDtypeStruct((B, H, Lq, Lk), q.dtype),
        ),
        grid_spec=pltpu.PrefetchScalarGridSpec(
            num_scalar_prefetch=0,
            grid=grid,
            in_specs=[
                pl.BlockSpec((None, None, tq, Dk), lambda b, h, qi: (b, h, qi, 0)),
                pl.BlockSpec((None, None, Lk, Dk), lambda b, h, qi: (b, h, 0, 0)),
                pl.BlockSpec((None, None, Lk, Dv), lambda b, h, qi: (b, h, 0, 0)),
                pl.BlockSpec((tq, Lk), lambda b, h, qi: (qi, 0)),
            ],
            out_specs=[
                pl.BlockSpec((None, None, tq, Dv), lambda b, h, qi: (b, h, qi, 0)),
                pl.BlockSpec((None, None, tq, Lk), lambda b, h, qi: (b, h, qi, 0)),
            ],
        ),
        compiler_params=pltpu.CompilerParams(
            dimension_semantics=("parallel", "parallel", "parallel"),
            vmem_limit_bytes=32 * 1024 * 1024,
        ),
    )(q, k, v, bias)
    return out, attn


def _reference(q, k, v, temperature, mask, attn_bias):
    attn = jnp.einsum("bhqd,bhkd->bhqk", q, k) / temperature
    Lq, Lk = attn.shape[-2:]
    attn = attn + attn_bias.reshape(1, 1, Lq, Lk)
    attn = jnp.where(mask == 0, _MASK_VALUE, attn)
    attn = jax.nn.softmax(attn, axis=-1)
    out = jnp.einsum("bhqk,bhkd->bhqd", attn, v)
    return out, attn


if __name__ == "__main__":
    B, H, L, Dk, Dv = 2, 2, 8, 32, 32
    temperature = float(Dk) ** 0.5

    key = jax.random.PRNGKey(0)
    kq, kk, kv, kb = jax.random.split(key, 4)
    q = jax.random.normal(kq, (B, H, L, Dk), dtype=jnp.float32)
    k = jax.random.normal(kk, (B, H, L, Dk), dtype=jnp.float32)
    v = jax.random.normal(kv, (B, H, L, Dv), dtype=jnp.float32)
    attn_bias = 0.1 * jax.random.normal(kb, (L, L), dtype=jnp.float32)

    # causal-style mask, broadcast over batch/head (no fully-masked rows)
    mask = jnp.tril(jnp.ones((L, L), dtype=jnp.int32)).reshape(1, 1, L, L)

    out, attn = scaled_dot_product_attention(
        q, k, v, temperature, mask=mask, attn_bias=attn_bias)
    out = jax.block_until_ready(out)
    attn = jax.block_until_ready(attn)

    ref_out, ref_attn = _reference(
        q, k, v, temperature, jnp.broadcast_to(mask, (B, H, L, L)), attn_bias)

    # tolerances account for the EUP approximate reciprocal in the softmax
    assert jnp.allclose(out, ref_out, atol=2e-3, rtol=2e-3)
    assert jnp.allclose(attn, ref_attn, atol=2e-3, rtol=2e-3)

    print("KERNEL_OK")
</pallas_src>

<mosaic_0001>
module attributes {stable_mosaic.version = 11 : i64} {
  func.func @_sdpa_kernel(%arg0: i32, %arg1: i32, %arg2: i32, %arg3: memref<1x1x8x32xf32, #tpu.memory_space<vmem>>, %arg4: memref<1x1x8x32xf32, #tpu.memory_space<vmem>>, %arg5: memref<1x1x8x32xf32, #tpu.memory_space<vmem>>, %arg6: memref<8x8xf32, #tpu.memory_space<vmem>>, %arg7: memref<1x1x8x32xf32, #tpu.memory_space<vmem>>, %arg8: memref<1x1x8x8xf32, #tpu.memory_space<vmem>>) attributes {dimension_semantics = [#tpu.dimension_semantics<parallel>, #tpu.dimension_semantics<parallel>, #tpu.dimension_semantics<parallel>], iteration_bounds = array<i64: 2, 2, 1>, scalar_prefetch = 0 : i64, scratch_operands = 0 : i64, tpu.core_type = #tpu.core_type<tc>, window_params = [{transform_indices = @transform_0, window_bounds = array<i64: 1, 1, 8, 32>}, {transform_indices = @transform_1, window_bounds = array<i64: 1, 1, 8, 32>}, {transform_indices = @transform_2, window_bounds = array<i64: 1, 1, 8, 32>}, {transform_indices = @transform_3, window_bounds = array<i64: 8, 8>}, {transform_indices = @transform_4, window_bounds = array<i64: 1, 1, 8, 32>}, {transform_indices = @transform_5, window_bounds = array<i64: 1, 1, 8, 8>}]} {
    %c0 = arith.constant 0 : index
    %c0_0 = arith.constant 0 : index
    %c0_1 = arith.constant 0 : index
    %c0_2 = arith.constant 0 : index
    %0 = vector.load %arg3[%c0, %c0_0, %c0_1, %c0_2] : memref<1x1x8x32xf32, #tpu.memory_space<vmem>>, vector<1x1x8x32xf32>
    %1 = vector.shape_cast %0 : vector<1x1x8x32xf32> to vector<8x32xf32>
    %c0_3 = arith.constant 0 : index
    %c0_4 = arith.constant 0 : index
    %c0_5 = arith.constant 0 : index
    %c0_6 = arith.constant 0 : index
    %2 = vector.load %arg4[%c0_3, %c0_4, %c0_5, %c0_6] : memref<1x1x8x32xf32, #tpu.memory_space<vmem>>, vector<1x1x8x32xf32>
    %3 = vector.shape_cast %2 : vector<1x1x8x32xf32> to vector<8x32xf32>
    %c0_7 = arith.constant 0 : index
    %c0_8 = arith.constant 0 : index
    %c0_9 = arith.constant 0 : index
    %c0_10 = arith.constant 0 : index
    %4 = vector.load %arg5[%c0_7, %c0_8, %c0_9, %c0_10] : memref<1x1x8x32xf32, #tpu.memory_space<vmem>>, vector<1x1x8x32xf32>
    %5 = vector.shape_cast %4 : vector<1x1x8x32xf32> to vector<8x32xf32>
    %cst = arith.constant dense<0.000000e+00> : vector<8x8xf32>
    %6 = tpu.matmul %1, %3, %cst {dimension_numbers = #tpu.dot_dimension_numbers<[1], [1], [0], [0], [0, 0, 1, 0], [], []>} : vector<8x32xf32>, vector<8x32xf32>, vector<8x8xf32> -> vector<8x8xf32>
    %cst_11 = arith.constant 0.176776692 : f32
    %7 = vector.broadcast %cst_11 : f32 to vector<8x8xf32>
    %8 = arith.mulf %6, %7 : vector<8x8xf32>
    %c0_12 = arith.constant 0 : index
    %c0_13 = arith.constant 0 : index
    %9 = vector.load %arg6[%c0_12, %c0_13] : memref<8x8xf32, #tpu.memory_space<vmem>>, vector<8x8xf32>
    %10 = arith.addf %8, %9 : vector<8x8xf32>
    %cst_14 = arith.constant dense<0xFF800000> : vector<8xf32>
    %11 = vector.multi_reduction <maximumf>, %10, %cst_14 [1] : vector<8x8xf32> to vector<8xf32>
    %12 = vector.shape_cast %11 : vector<8xf32> to vector<8x1xf32>
    %13 = vector.broadcast %12 : vector<8x1xf32> to vector<8x8xf32>
    %14 = arith.subf %10, %13 : vector<8x8xf32>
    %15 = math.exp %14 : vector<8x8xf32>
    %cst_15 = arith.constant dense<0.000000e+00> : vector<8xf32>
    %16 = vector.multi_reduction <add>, %15, %cst_15 [1] : vector<8x8xf32> to vector<8xf32>
    %17 = vector.shape_cast %16 : vector<8xf32> to vector<8x1xf32>
    %18 = tpu.reciprocal %17 {approx = true} : vector<8x1xf32> -> vector<8x1xf32>
    %19 = vector.broadcast %18 : vector<8x1xf32> to vector<8x8xf32>
    %20 = arith.mulf %15, %19 : vector<8x8xf32>
    %cst_16 = arith.constant dense<0.000000e+00> : vector<8x32xf32>
    %21 = tpu.matmul %20, %5, %cst_16 {dimension_numbers = #tpu.dot_dimension_numbers<[1], [0], [0], [1], [0, 0, 1, 1], [], []>} : vector<8x8xf32>, vector<8x32xf32>, vector<8x32xf32> -> vector<8x32xf32>
    %c0_17 = arith.constant 0 : index
    %c0_18 = arith.constant 0 : index
    %c0_19 = arith.constant 0 : index
    %c0_20 = arith.constant 0 : index
    %22 = vector.load %arg7[%c0_17, %c0_18, %c0_19, %c0_20] : memref<1x1x8x32xf32, #tpu.memory_space<vmem>>, vector<1x1x8x32xf32>
    %23 = vector.shape_cast %22 : vector<1x1x8x32xf32> to vector<8x32xf32>
    %24 = vector.shape_cast %21 : vector<8x32xf32> to vector<1x1x8x32xf32>
    tpu.vector_store %arg7[%c0_17, %c0_18, %c0_19, %c0_20], %24 {strides = array<i32>} : memref<1x1x8x32xf32, #tpu.memory_space<vmem>>, vector<1x1x8x32xf32>,
    %c0_21 = arith.constant 0 : index
    %c0_22 = arith.constant 0 : index
    %c0_23 = arith.constant 0 : index
    %c0_24 = arith.constant 0 : index
    %25 = vector.load %arg8[%c0_21, %c0_22, %c0_23, %c0_24] : memref<1x1x8x8xf32, #tpu.memory_space<vmem>>, vector<1x1x8x8xf32>
    %26 = vector.shape_cast %25 : vector<1x1x8x8xf32> to vector<8x8xf32>
    %27 = vector.shape_cast %20 : vector<8x8xf32> to vector<1x1x8x8xf32>
    tpu.vector_store %arg8[%c0_21, %c0_22, %c0_23, %c0_24], %27 {strides = array<i32>} : memref<1x1x8x8xf32, #tpu.memory_space<vmem>>, vector<1x1x8x8xf32>,
    return
  }
  func.func @transform_0(%arg0: i32, %arg1: i32, %arg2: i32) -> (i32, i32, i32, i32) {
    %c0_i32 = arith.constant 0 : i32
    %c0_i32_0 = arith.constant 0 : i32
    return %arg0, %arg1, %arg2, %c0_i32 : i32, i32, i32, i32
  }
  func.func @transform_1(%arg0: i32, %arg1: i32, %arg2: i32) -> (i32, i32, i32, i32) {
    %c0_i32 = arith.constant 0 : i32
    %c0_i32_0 = arith.constant 0 : i32
    %c0_i32_1 = arith.constant 0 : i32
    return %arg0, %arg1, %c0_i32, %c0_i32_0 : i32, i32, i32, i32
  }
  func.func @transform_2(%arg0: i32, %arg1: i32, %arg2: i32) -> (i32, i32, i32, i32) {
    %c0_i32 = arith.constant 0 : i32
    %c0_i32_0 = arith.constant 0 : i32
    %c0_i32_1 = arith.constant 0 : i32
    return %arg0, %arg1, %c0_i32, %c0_i32_0 : i32, i32, i32, i32
  }
  func.func @transform_3(%arg0: i32, %arg1: i32, %arg2: i32) -> (i32, i32) {
    %c0_i32 = arith.constant 0 : i32
    %c0_i32_0 = arith.constant 0 : i32
    return %arg2, %c0_i32 : i32, i32
  }
  func.func @transform_4(%arg0: i32, %arg1: i32, %arg2: i32) -> (i32, i32, i32, i32) {
    %c0_i32 = arith.constant 0 : i32
    %c0_i32_0 = arith.constant 0 : i32
    return %arg0, %arg1, %arg2, %c0_i32 : i32, i32, i32, i32
  }
  func.func @transform_5(%arg0: i32, %arg1: i32, %arg2: i32) -> (i32, i32, i32, i32) {
    %c0_i32 = arith.constant 0 : i32
    %c0_i32_0 = arith.constant 0 : i32
    return %arg0, %arg1, %arg2, %c0_i32 : i32, i32, i32, i32
  }
}

</mosaic_0001>

<bundles_post_ra>
// kernel: tpu_custom_call.1
= control target key start
LH: loop header
LB: loop body
LE: loop exit
PB: predicated region body
PF: predicated region fallthrough
CT: control target
= control target key end

     0   :  { %s1510_s0 = inlined_call_operand.hbm [shape: f32[2,2,8,32], index: 0, kind: input, shape index: {}]   ;;  %s1511_s1 = inlined_call_operand.hbm [shape: f32[2,2,8,32], index: 1, kind: input, shape index: {}]   ;;  %s1512_s2 = inlined_call_operand.hbm [shape: f32[2,2,8,32], index: 2, kind: input, shape index: {}]   ;;  %s1513_s3 = inlined_call_operand.vmem [shape: f32[8,8], index: 3, kind: input, shape index: {}]   ;;  %s1514_s4 = inlined_call_operand.hbm [shape: f32[2,2,8,32], index: 4, kind: output, shape index: {0}]   ;;  %s1515_s5 = inlined_call_operand.hbm [shape: f32[2,2,8,8], index: 5, kind: output, shape index: {1}]  }
   0x1   :  { %1528 = sst [smem:[#allocation23_spill]] %s1511_s1 }
   0x2   :  { %11 = vsyncpa [#allocation3], 0 }
   0x3   :  { %13 = vsyncpa [#allocation3 + $0x1], 0 }
   0x4   :  { %14 = vsyncpa [#allocation6], 0 }
   0x5   :  { %16 = vsyncpa [#allocation6 + $0x1], 0 }
   0x6   :  { %17 = vsyncpa [#allocation4], 0 }
   0x7   :  { %19 = vsyncpa [#allocation4 + $0x1], 0 }
   0x8   :  { %20 = vsyncpa [#allocation10], 0 }
   0x9   :  { %22 = vsyncpa [#allocation10 + $0x1], 0  ;;  %s1183_s18 = smov 0   ;;  %s1185_s19 = smov 0  }
   0xa   :  { %s1187_s20 = smov 0   ;;  %s1189_s21 = smov 0  }
   0xb   :  { %s1191_s22 = smov 0   ;;  %s1193_s23 = smov 0  }
   0xc   :  { %s1195_s24 = smov 0   ;;  %s1197_s25 = smov 0  }
   0xd LB: > { %1529 = sst [smem:[#allocation15_spill]] %s1116_s18  ;;  %s1224_s26 = sadd.s32 4294967295, %s1144_s25   ;;  %s1144_s25 = sphi %s1197_s25, %s28_s25   ;;  %s1140_s24 = sphi %s1195_s24, %s1560_s24   ;;  %s1136_s23 = sphi %s1193_s23, %s1559_s23   ;;  %s1132_s22 = sphi %s1191_s22, %s1558_s22   ;;  %s1128_s21 = sphi %s1189_s21, %s1557_s21   ;;  %s1124_s20 = sphi %s1187_s20, %s1563_s20   ;;  %s1120_s19 = sphi %s1185_s19, %s1562_s19   ;;  %s1116_s18 = sphi %s1183_s18, %s1561_s18  }
   0xe   : > { %1530 = sst [smem:[#allocation16_spill]] %s1136_s23  ;;  %s777_s27 = sadd.s32 4294967294, %s1144_s25  }
   0xf   : > { %1531 = sst [smem:[#allocation17_spill]] %s1140_s24  ;;  %s43_s28 = sadd.s32 1, %s1136_s23 }
  0x10   : > { %1532 = sst [smem:[#allocation18_spill]] %s1144_s25  ;;  %s47_s29 = sadd.s32 1, %s1140_s24 }
  0x11   : > { %p45_p0 = scmp.ge.s32.totalorder %s43_s28, 2  ;;  %s58_s30 = sadd.s32 1, %s1124_s20 }
  0x12   : > { %p65_p1 = scmp.ne.s32.totalorder %s1124_s20, %s1120_s19  ;;  %p66_p2 = scmp.eq.s32.totalorder %s1144_s25, 0 }
  0x13   : > { %s1565_s28 = smov (%p45_p0, %s43_s28), 0  ;;  %s1567_s29 = smov (!%p45_p0, %s47_s29), %s1140_s24 }
  0x14   : > { %1533 = sst [smem:[#allocation19_spill]] %s1565_s28  ;;  %s52_s6 = ssub.s32 %s1136_s23, %s1565_s28 }
  0x15   : > { %p1238_p3 = por %p66_p2, %p65_p1  ;;  %p49_p4 = scmp.ge.s32.totalorder %s1567_s29, 2 }
  0x16   : > { %p71_p5 = scmp.ne.s32.totalorder %s1120_s19, %s1116_s18  ;;  %p72_p6 = scmp.eq.s32.totalorder %s1224_s26, 0 }
  0x17   : > { %p181_p7 = scmp.eq.s32.totalorder %s1224_s26, 3  ;;  %s1569_s29 = smov (%p49_p4, %s1567_s29), 0 }
  0x18   : > { %1535 = sst [smem:[#allocation20_spill]] %s1569_s29  ;;  %p1248_p8 = por %p72_p6, %p71_p5 }
  0x19   : > { %p1252_p9 = por %p181_p7, %p65_p1  ;;  %s51_s10 = ssub.s32 %s1140_s24, %s1569_s29 }
  0x1a   : > { %s1536_s8 = scalar_select %p1248_p8, 1, 0 }
  0x1b   : > { %s1537_s9 = scalar_select %p1252_p9, 1, 0 }
  0x1c   : > { %p187_p10 = scmp.eq.s32.totalorder %s777_s27, 3  ;;  %s53_s11 = sor.u32 %s52_s6, %s51_s10 }
  0x1d   : > { %p56_p11 = scmp.eq.s32.totalorder %s53_s11, 0  ;;  %p848_p13 = scmp.lt.s32.totalorder %s1144_s25, 4 }
  0x1e   : > { %p1258_p12 = por %p187_p10, %p71_p5  ;;  %s1517_s13 = sand.u32 1, %s1124_s20  }
  0x1f   : > { %s1265_s14 = scalar_select %p56_p11, %s1124_s20, %s58_s30  }
  0x20   : > { %s1538_s12 = scalar_select %p1258_p12, 1, 0 }
  0x21   : > { %1540 = sst [smem:[#allocation22_spill]] %s1265_s14  ;;  %s1269_s15 = sshll.u32 %s1517_s13, 3 }
  0x22   : > { %1539 = sst [smem:[#allocation21_spill]] %s1538_s12  ;;  %s782_s16 = sshll.u32 %s1140_s24, 1 }
  0x23   : > { %s254_s17 = sadd.s32 %s1136_s23, %s782_s16  ;;  %p1275_p0 = pnand %p848_p13, %p1238_p3 }
  0x24   : > { %s1279_s6 = sshll.u32 %s254_s17, 7  ;;  %s265_s10 = sand.u32 1, %s1144_s25  }
  0x25   : > { %s1541_s27 = scalar_select %p1275_p0, 1, 0 }
  0x26   : > { %s1542_s1 = sld [smem:[#allocation23_spill]]  ;;  %s269_s16 = scalar_lea.vmem [#allocation5], %s1269_s15 }
  0x27   : > { %s278_s7 = sshll.u32 %s269_s16, 4  ;;  %s1293_s13 = scalar_lea.sflag [#allocation6], %s265_s10  ;;  %s1290_s7 = int_to_ptr.vmem [resolvable:$true] %s278_s7 }
  0x28   : > { %p1299_p4 = pneg %p1275_p0 }
  0x2c   : > { %s1286_s30 = scalar_lea.hbm %s1542_s1, %s1279_s6  ;;  %s925_s16 = scalar_lea.hbm %s1542_s1, 512 }
  0x2d   : > { %s920_s17 = scalar_lea.hbm %s1286_s30, 128  ;;  %p926_p7 = scmp.lt.u32.totalorder %s1286_s30, %s1542_s1 }
  0x2e   : > { %p921_p3 = scmp.ne.s32.totalorder %s1286_s30, %s920_s17  ;;  %p927_p10 = scmp.lt.u32.totalorder %s925_s16, %s920_s17 }
  0x2f   : > { %p929_p13 = scmp.lt.u32.totalorder %s920_s17, %s1286_s30 }
  0x30   : > { %p923_p5 = pnand %p1299_p4, %p921_p3  ;;  %p928_p11 = por %p927_p10, %p926_p7 }
  0x32   : > { %p924_p6 = pneg %p923_p5  ;;  %p930_p1 = por %p929_p13, %p928_p11 }
  0x34   : > { %p931_p2 = pnand %p930_p1, %p924_p6 }
  0x36   : > { %934 = shalt.err (!%p931_p2)
}
  0x37   : > { %s935_s10 = scalar_lea.vmem %s1290_s7, 128  ;;  %s1146_s29 = smov [#allocation5]  }
  0x38   : > { %p936_p3 = scmp.ne.s32.totalorder %s1290_s7, %s935_s10  ;;  %s940_s11 = sshll.u32 %s1146_s29, 4  ;;  %s941_s11 = int_to_ptr.vmem [resolvable:$false] %s940_s11 }
  0x39   : > { %s942_s23 = scalar_lea.vmem %s941_s11, 256  ;;  %p943_p9 = scmp.lt.s32.totalorder %s1290_s7, %s941_s11 }
  0x3a   : > { %p938_p5 = pnand %p936_p3, %p1299_p4  ;;  %p944_p8 = scmp.lt.s32.totalorder %s942_s23, %s935_s10 }
  0x3c   : > { %p939_p12 = pneg %p938_p5  ;;  %p945_p7 = por %p944_p8, %p943_p9 }
  0x3e   : > { %p946_p10 = pnand %p945_p7, %p939_p12 }
  0x40   : > { %949 = shalt.err (!%p946_p10)
}
  0x41   : > { %837 = dma.hbm_to_vmem [thread:$0]  (!%p1275_p0), %s1286_s30, 128, %s1290_s7, %s1293_s13  }
  0x42   : > { %p1544_p1 = scmp.lt.s32.totalorder %s1144_s25, 5  ;;  %p1545_p2 = scmp.ge.s32.totalorder %s1144_s25, 1 }
  0x43   : > { %s1335_s10 = scalar_lea.hbm %s1510_s0, %s1279_s6  ;;  %s248_s29 = scalar_lea.vmem [#allocation2], %s1269_s15 }
  0x44   : > { %p1327_p6 = pnand %p1545_p2, %p1544_p1  ;;  %s258_s11 = sshll.u32 %s248_s29, 4  ;;  %s1338_s11 = int_to_ptr.vmem [resolvable:$true] %s258_s11 }
  0x45   : > { %s1344_s23 = scalar_lea.hbm %s1512_s2, %s1279_s6  ;;  %s1547_s1 = sand.u32 1, %s1124_s20  }
  0x46   : > { %s1546_s24 = scalar_select %p1327_p6, 1, 0 }
  0x47   : > { %s245_s14 = scalar_lea.sflag [#allocation3], %s1547_s1  ;;  %s950_s12 = scalar_lea.hbm %s1335_s10, 128 }
  0x48   : > { %p951_p8 = scmp.ne.s32.totalorder %s1335_s10, %s950_s12  ;;  %s955_s18 = scalar_lea.hbm %s1510_s0, 512 }
  0x49   : > { %p956_p11 = scmp.lt.u32.totalorder %s1335_s10, %s1510_s0  ;;  %p957_p13 = scmp.lt.u32.totalorder %s955_s18, %s950_s12 }
  0x4a   : > { %p953_p9 = pnand %p951_p8, %p1299_p4  ;;  %p959_p5 = scmp.lt.u32.totalorder %s950_s12, %s1335_s10 }
  0x4b   : > { %p958_p3 = por %p957_p13, %p956_p11 }
  0x4c   : > { %p954_p12 = pneg %p953_p9 }
  0x4d   : > { %p960_p7 = por %p959_p5, %p958_p3 }
  0x4f   : > { %p961_p10 = pnand %p960_p7, %p954_p12 }
  0x51   : > { %964 = shalt.err (!%p961_p10)
}
  0x52   : > { %s965_s1 = scalar_lea.vmem %s1338_s11, 128  ;;  %s1147_s6 = smov [#allocation2]  }
  0x53   : > { %p966_p1 = scmp.ne.s32.totalorder %s1338_s11, %s965_s1  ;;  %s970_s30 = sshll.u32 %s1147_s6, 4  ;;  %s971_s30 = int_to_ptr.vmem [resolvable:$false] %s970_s30 }
  0x54   : > { %s972_s25 = scalar_lea.vmem %s971_s30, 256  ;;  %p973_p9 = scmp.lt.s32.totalorder %s1338_s11, %s971_s30 }
  0x55   : > { %p968_p2 = pnand %p966_p1, %p1299_p4  ;;  %p974_p6 = scmp.lt.s32.totalorder %s972_s25, %s965_s1 }
  0x57   : > { %p969_p8 = pneg %p968_p2  ;;  %p975_p11 = por %p974_p6, %p973_p9 }
  0x59   : > { %p976_p13 = pnand %p975_p11, %p969_p8 }
  0x5b   : > { %979 = shalt.err (!%p976_p13)
}
  0x5c   : > { %834 = dma.hbm_to_vmem [thread:$0]  (!%p1275_p0), %s1335_s10, 128, %s1338_s11, %s245_s14  }
  0x5d   : > { %s289_s18 = scalar_lea.vmem [#allocation7], %s1269_s15  ;;  %s980_s7 = scalar_lea.hbm %s1344_s23, 128 }
  0x5e   : > { %s298_s12 = sshll.u32 %s289_s18, 4  ;;  %p981_p12 = scmp.ne.s32.totalorder %s1344_s23, %s980_s7  ;;  %s299_s12 = int_to_ptr.vmem [resolvable:$true] %s298_s12 }
  0x5f   : > { %s985_s29 = scalar_lea.hbm %s1512_s2, 512  ;;  %p986_p5 = scmp.lt.u32.totalorder %s1344_s23, %s1512_s2 }
  0x60   : > { %p983_p6 = pnand %p981_p12, %p1299_p4  ;;  %p987_p7 = scmp.lt.u32.totalorder %s985_s29, %s980_s7 }
  0x61   : > { %p989_p1 = scmp.lt.u32.totalorder %s980_s7, %s1344_s23 }
  0x62   : > { %p984_p3 = pneg %p983_p6  ;;  %p988_p10 = por %p987_p7, %p986_p5 }
  0x64   : > { %p990_p2 = por %p989_p1, %p988_p10 }
  0x66   : > { %p991_p8 = pnand %p990_p2, %p984_p3 }
  0x68   : > { %994 = shalt.err (!%p991_p8)
}
  0x69   : > { %s995_s14 = scalar_lea.vmem %s299_s12, 128  ;;  %s1148_s15 = smov [#allocation7]  }
  0x6a   : > { %p996_p9 = scmp.ne.s32.totalorder %s299_s12, %s995_s14  ;;  %s1000_s10 = sshll.u32 %s1148_s15, 4  ;;  %s1001_s10 = int_to_ptr.vmem [resolvable:$false] %s1000_s10 }
  0x6b   : > { %s1002_s11 = scalar_lea.vmem %s1001_s10, 256  ;;  %p1003_p12 = scmp.lt.s32.totalorder %s299_s12, %s1001_s10 }
  0x6c   : > { %p998_p11 = pnand %p996_p9, %p1299_p4  ;;  %p1004_p6 = scmp.lt.s32.totalorder %s1002_s11, %s995_s14 }
  0x6e   : > { %p999_p13 = pneg %p998_p11  ;;  %p1005_p0 = por %p1004_p6, %p1003_p12 }
  0x70   : > { %p1006_p5 = pnand %p1005_p0, %p999_p13 }
  0x72   : > { %1009 = shalt.err (!%p1006_p5)
}
  0x73   : > { %p1548_p7 = scmp.ne.s32.totalorder %s1541_s27, 0  ;;  %p1549_p3 = scmp.ne.s32.totalorder %s1546_s24, 0 }
  0x74   : > { %s1391_s28 = sand.u32 (!%p1549_p3), 1, %s1120_s19   ;;  %p1550_p0 = scmp.ne.s32.totalorder (!%p1549_p3), %s1536_s8, 0 }
  0x75   : > { %840 = dma.hbm_to_vmem [thread:$0]  (!%p1548_p7), %s1344_s23, 128, %s299_s12, %s1293_s13  }
  0x76   : > { %307 = sbr.rel (%p1549_p3) target bundleno = 891 (0x37b), region = 36  ;;  %s1394_s30 = sshll.u32 (!%p1549_p3), %s1391_s28, 3 }
  0x77   : > { %s310_s25 = scalar_lea.sflag (!%p1549_p3), [#allocation3], %s1391_s28  ;;  %s313_s18 = scalar_lea.vmem (!%p1549_p3), [#allocation2], %s1394_s30 }
  0x7d   : > { %1099 = dma.done.wait (%p1550_p0), %s310_s25, 128  }
  0x7e   : > { %1101 = vsyncadd (%p1550_p0), %s310_s25, 4294967168  ;;  %s318_s13 = sand.u32 1, %s1224_s26   ;;  %s322_s24 = scalar_lea.vmem [#allocation5], %s1394_s30 }
  0x7f   : > { %s319_s27 = scalar_lea.sflag [#allocation6], %s318_s13 }
  0x80   : > { %1103 = dma.done.wait (%p1550_p0), %s319_s27, 256  }
  0x81   : > { %1105 = vsyncadd (%p1550_p0), %s319_s27, 4294967040  ;;  %v1149_v0 = vmov 0.0   ;;  %vm1150_vm0 = vmmov 0   ;;  %vm384_vm1 = vcmask 261120   ;;  %v382_v1 = vld [vmem:[%s322_s24] sm:$0xff]  ;;  %v381_v2 = vld [vmem:[%s313_s18] sm:$0xff] }
  0x82   : > { %811 = vmatprep.subr.mxu0 %v1149_v0  ;;  %813 = vmatprep.mubr.msk.f32.mxu0 %vm1150_vm0, %v1149_v0  ;;  %v462_v4 = vld [vmem:[%s1513_s3] sm:$0xff]  ;;  %vm464_vm2 = vcmask 64512   ;;  %s331_s8 = scalar_lea.vmem [#allocation7], %s1394_s30  ;;  %s376_s12 = scalar_lea.vmem [#allocation9], %s1394_s30 }
  0x83   : > { %816 = vmatprep.subr.mxu1 %v1149_v0  ;;  %818 = vmatprep.mubr.msk.f32.mxu1 %vm1150_vm0, %v1149_v0  ;;  %v383_v14 = vld [vmem:[%s331_s8] sm:$0xff]  ;;  %s801_s7 = sshll.u32 %s1132_s22, 1  ;;  %s589_s14 = sshll.u32 %s376_s12, 4  ;;  %s590_s14 = int_to_ptr.vmem [resolvable:$true] %s589_s14 }
  0x84   : > { %812 = vmatpush3.xpose.msk.msra.mxu0 %vm384_vm1, %v382_v1  ;;  %817 = vmatpush3.msra.mxu1 %v383_v14  ;;  %s1421_s17 = sadd.s32 %s1128_s21, %s801_s7  ;;  %s557_s15 = scalar_lea.sflag [#allocation10], %s1391_s28 }
  0x85   : > { %s802_s16 = sshll.u32 %s1421_s17, 7  ;;  %s1010_s10 = scalar_lea.vmem %s590_s14, 128 }
  0x86   : > { %s1429_s6 = scalar_lea.hbm %s1515_s5, %s802_s16  ;;  %p1011_p4 = scmp.ne.s32.totalorder %s590_s14, %s1010_s10 }
  0x87   : > { %814 = vmatmul.mubr.msk.f32.vlgmr.msra.gmra.mrb[0].mxu0 %vm384_vm1, %v381_v2  ;;  %p1551_p10 = scmp.ne.s32.totalorder %s1537_s9, 0  ;;  %s1151_s22 = smov [#allocation9]  }
  0x88   : > { %s1014_s21 = sshll.u32 %s1151_s22, 4  ;;  %s1015_s21 = int_to_ptr.vmem [resolvable:$false] %s1014_s21 }
  0x89   : > { %p1012_p1 = pnand %p1011_p4, %p1551_p10  ;;  %s1016_s11 = scalar_lea.vmem %s1015_s21, 256 }
  0x8a   : > { %p1017_p8 = scmp.lt.s32.totalorder %s590_s14, %s1015_s21  ;;  %p1018_p9 = scmp.lt.s32.totalorder %s1016_s11, %s1010_s10 }
  0x8b   : > { %p1013_p2 = pneg %p1012_p1 }
  0x8c   : > { %p1019_p11 = por %p1018_p9, %p1017_p8 }
  0x8e   : > { %p1020_p13 = pnand %p1019_p11, %p1013_p2 }
 0x15a   : > { %v457_v3 = vpop.f32.mrb[0].mxu0 }
 0x15b   : > { %v461_v5 = vmul.f32 0.17677669, %v457_v3  ;;  %v815_v6 = vpop.f32.mrb[1].mxu0 }
 0x15d   : > { %v463_v7 = vadd.f32 %v462_v4, %v461_v5 }
 0x15f   : > { %v465_v8 = vsel %vm464_vm2, %v463_v7, -inf }
 0x160   : > { %466 = vmax.xlane.f32.xlu0 %v465_v8 }
 0x1ed   : > { %v467_v9 = vpop.xlane.xlu0 %466 }
 0x1ee   : > { %v468_v10 = vsub.f32 %v463_v7, %v467_v9 }
 0x1f0   : > { %v469_v11 = vmul.f32 1.442695, %v468_v10 }
 0x1f2   : > { %916 = vpow2.f32 %v469_v11 }
 0x1fc   : > { %v917_v12 = vpop.eup %916 }
 0x1fd   : > { %v471_v13 = vsel %vm464_vm2, %v917_v12, 0.0 }
 0x1fe   : > { %472 = vadd.xlane.f32.xlu0 %v471_v13 }
 0x28b   : > { %v473_v15 = vpop.xlane.xlu0 %472 }
 0x28c   : > { %918 = vrcp.f32 %v473_v15 }
 0x296   : > { %v919_v16 = vpop.eup %918 }
 0x297   : > { %v475_v17 = vmul.f32 %v919_v16, %v917_v12 }
 0x299   : > { %819 = vmatmul.mubr.msk.f32.vlgmr.msra.gmra.mrb[0].mxu1 %vm464_vm2, %v475_v17  ;;  %550 = vst.msk [vmem:[%s376_s12] sm:$0xff] %vm464_vm2, %v475_v17 }
 0x29a   : > { %1023 = shalt.err (!%p1020_p13)
}
 0x29b   : > { %s1024_s25 = scalar_lea.hbm %s1429_s6, 128  ;;  %s1028_s27 = scalar_lea.hbm %s1515_s5, 512 }
 0x29c   : > { %p1025_p12 = scmp.ne.s32.totalorder %s1429_s6, %s1024_s25  ;;  %p1029_p7 = scmp.lt.u32.totalorder %s1429_s6, %s1515_s5 }
 0x29d   : > { %p1030_p3 = scmp.lt.u32.totalorder %s1028_s27, %s1024_s25  ;;  %p1032_p4 = scmp.lt.u32.totalorder %s1024_s25, %s1429_s6 }
 0x29e   : > { %p1026_p6 = pnand %p1025_p12, %p1551_p10 }
 0x29f   : > { %p1031_p0 = por %p1030_p3, %p1029_p7 }
 0x2a0   : > { %p1027_p5 = pneg %p1026_p6 }
 0x2a1   : > { %p1033_p1 = por %p1032_p4, %p1031_p0 }
 0x2a3   : > { %p1034_p2 = pnand %p1033_p1, %p1027_p5 }
 0x2a5   : > { %1037 = shalt.err (!%p1034_p2)
}
 0x2a6   : > { %828 = dma.vmem_to_hbm [thread:$0]  (%p1551_p10), %s590_s14, 128, %s1429_s6, %s557_s15  }
 0x2a7   : > { %s369_s23 = scalar_lea.vmem [#allocation8], %s1394_s30  ;;  %s1455_s29 = scalar_lea.hbm %s1514_s4, %s802_s16 }
 0x2a8   : > { %s573_s8 = sshll.u32 %s369_s23, 4  ;;  %s552_s1 = scalar_lea.sflag [#allocation4], %s1391_s28  ;;  %s1457_s8 = int_to_ptr.vmem [resolvable:$true] %s573_s8 }
 0x2a9   : > { %s1038_s10 = scalar_lea.vmem %s1457_s8, 128  ;;  %s1152_s30 = smov [#allocation8]  }
 0x2aa   : > { %p1039_p8 = scmp.ne.s32.totalorder %s1457_s8, %s1038_s10  ;;  %s1042_s17 = sshll.u32 %s1152_s30, 4  ;;  %s1043_s17 = int_to_ptr.vmem [resolvable:$false] %s1042_s17 }
 0x2ab   : > { %s1044_s16 = scalar_lea.vmem %s1043_s17, 256  ;;  %p1045_p13 = scmp.lt.s32.totalorder %s1457_s8, %s1043_s17 }
 0x2ac   : > { %p1040_p9 = pnand %p1039_p8, %p1551_p10  ;;  %p1046_p12 = scmp.lt.s32.totalorder %s1044_s16, %s1038_s10 }
 0x2ae   : > { %p1041_p11 = pneg %p1040_p9  ;;  %p1047_p6 = por %p1046_p12, %p1045_p13 }
 0x2b0   : > { %p1048_p5 = pnand %p1047_p6, %p1041_p11 }
 0x36c   : > { %v545_v18 = vpop.f32.mrb[0].mxu1 }
 0x36d   : > { %549 = vst.msk [vmem:[%s369_s23] sm:$0xff] %vm384_vm1, %v545_v18  ;;  %v820_v19 = vpop.f32.mrb[1].mxu1 }
 0x36e   : > { %1051 = shalt.err (!%p1048_p5)
}
 0x36f   : > { %s1052_s28 = scalar_lea.hbm %s1455_s29, 128  ;;  %s1056_s15 = scalar_lea.hbm %s1514_s4, 512 }
 0x370   : > { %p1053_p7 = scmp.ne.s32.totalorder %s1455_s29, %s1052_s28  ;;  %p1057_p4 = scmp.lt.u32.totalorder %s1455_s29, %s1514_s4 }
 0x371   : > { %p1058_p1 = scmp.lt.u32.totalorder %s1056_s15, %s1052_s28  ;;  %p1060_p8 = scmp.lt.u32.totalorder %s1052_s28, %s1455_s29 }
 0x372   : > { %p1054_p3 = pnand %p1053_p7, %p1551_p10 }
 0x373   : > { %p1059_p2 = por %p1058_p1, %p1057_p4 }
 0x374   : > { %p1055_p0 = pneg %p1054_p3 }
 0x375   : > { %p1061_p9 = por %p1060_p8, %p1059_p2 }
 0x377   : > { %p1062_p11 = pnand %p1061_p9, %p1055_p0 }
 0x379   : > { %1065 = shalt.err (!%p1062_p11)
}
 0x37a   : > { %827 = dma.vmem_to_hbm [thread:$0]  (%p1551_p10), %s1457_s8, 128, %s1455_s29, %s552_s1  }
 0x37b PF: > { %s1552_s11 = sld [smem:[#allocation18_spill]]  ;;  %s1553_s25 = sld [smem:[#allocation15_spill]] }
 0x37c   : > { %s1554_s18 = sld [smem:[#allocation21_spill]] }
 0x381   : > { %p849_p13 = scmp.ge.s32.totalorder %s1552_s11, 2  ;;  %s601_s13 = sand.u32 1, %s1553_s25  }
 0x382   : > { %p1555_p12 = scmp.ne.s32.totalorder %s1554_s18, 0  ;;  %s602_s27 = scalar_lea.sflag [#allocation4], %s601_s13 }
 0x384   : > { %p842_p6 = pnand %p849_p13, %p1555_p12 }
 0x386   : > { %1107 = dma.done.wait (!%p842_p6), %s602_s27, 128  }
 0x387   : > { %1109 = vsyncadd (!%p842_p6), %s602_s27, 4294967168  ;;  %s611_s24 = scalar_lea.sflag [#allocation10], %s601_s13 }
 0x388   : > { %1111 = dma.done.wait (!%p842_p6), %s611_s24, 128  }
 0x389   : > { %1113 = vsyncadd (!%p842_p6), %s611_s24, 4294967168  ;;  %s28_s25 = sadd.s32 1, %s1552_s11   ;;  %s1556_s9 = sld [smem:[#allocation22_spill]] }
 0x38a   : > { %p25_p5 = scmp.ge.s32.totalorder %s28_s25, 6   ;;  %s1557_s21 = sld [smem:[#allocation16_spill]] }
 0x38b   : > { %s1558_s22 = sld [smem:[#allocation17_spill]]  ;;  %s1559_s23 = sld [smem:[#allocation19_spill]] }
 0x38c   : > { %s1560_s24 = sld [smem:[#allocation20_spill]]  ;;  %s1561_s18 = smov %s1120_s19 }
 0x38d   : > { %s1562_s19 = smov %s1124_s20  ;;  %27 = sbr.rel (!%p25_p5) target bundleno = 13 (0xd), region = 125 }
 0x38f   : > { %s1563_s20 = smov %s1556_s9 }
 0x394   :  { %616 = vsyncpa [#allocation3], 1 }
 0x395   :  { %618 = vsyncpa [#allocation3 + $0x1], 1 }
 0x396   :  { %619 = vsyncpa [#allocation6], 1 }
 0x397   :  { %621 = vsyncpa [#allocation6 + $0x1], 1 }
 0x398   :  { %622 = vsyncpa [#allocation4], 1 }
 0x399   :  { %624 = vsyncpa [#allocation4 + $0x1], 1 }
 0x39a   :  { %625 = vsyncpa [#allocation10], 1 }
 0x39b   :  { %627 = vsyncpa [#allocation10 + $0x1], 1 }

</bundles_post_ra>
